<compile_context>
chip_gen: v6e
topology: v6e:2x2x1
jax: 0.10.0
libtpu: 0.0.40
codegen_flags: <defaults>
</compile_context>

<pallas_src>
import math
import jax
import jax.numpy as jnp
from jax.experimental import pallas as pl
from jax.experimental.pallas import tpu as pltpu


def _largest_divisor_le(n: int, target: int) -> int:
    t = min(n, target)
    while n % t != 0:
        t -= 1
    return t


def _linear_kernel(x_ref, w_ref, b_ref, o_ref, acc_ref):
    # x_ref: (tm, tk), w_ref: (tk, tn), b_ref: (1, tn), o_ref: (tm, tn)
    k = pl.program_id(2)

    @pl.when(k == 0)
    def _():
        acc_ref[...] = jnp.zeros_like(acc_ref)

    acc_ref[...] += jnp.dot(
        x_ref[...], w_ref[...], preferred_element_type=jnp.float32
    )

    @pl.when(k == pl.num_programs(2) - 1)
    def _():
        o_ref[...] = (acc_ref[...] + b_ref[...].astype(jnp.float32)).astype(o_ref.dtype)


def input_embedding_forward(x, weight, bias, *, tm=256, tn=256, tk=512):
    """y = x @ weight.T + bias, applied over the last dim of x.

    x:      (..., input_dim)
    weight: (d_model, input_dim)   (PyTorch nn.Linear layout)
    bias:   (d_model,)
    returns (..., d_model)
    """
    *lead, K = x.shape
    N = weight.shape[0]
    M = int(math.prod(lead)) if lead else 1

    x2 = x.reshape(M, K)          # lane-dense 2-D activations
    w = weight.T                  # (K, N) so kernel does a plain (M,K)x(K,N) matmul
    b2 = bias.reshape(1, N)       # 2-D for TPU layout

    tm = _largest_divisor_le(M, tm)
    tn = _largest_divisor_le(N, tn)
    tk = _largest_divisor_le(K, tk)

    out = pl.pallas_call(
        _linear_kernel,
        out_shape=jax.ShapeDtypeStruct((M, N), x.dtype),
        grid_spec=pl.GridSpec(
            grid=(M // tm, N // tn, K // tk),
            in_specs=[
                pl.BlockSpec((tm, tk), lambda i, j, k: (i, k)),   # activations
                pl.BlockSpec((tk, tn), lambda i, j, k: (k, j)),   # weight (transposed)
                pl.BlockSpec((1, tn), lambda i, j, k: (0, j)),    # bias, broadcast over M
            ],
            out_specs=pl.BlockSpec((tm, tn), lambda i, j, k: (i, j)),
            scratch_shapes=[pltpu.VMEM((tm, tn), jnp.float32)],
        ),
        compiler_params=pltpu.CompilerParams(
            dimension_semantics=("parallel", "parallel", "arbitrary"),
        ),
    )(x2, w, b2)

    return out.reshape(*lead, N)


if __name__ == "__main__":
    # Small transformer-ish shapes: batch=2, seq=8, input_dim=16, d_model=32.
    B, S, IN_DIM, D_MODEL = 2, 8, 16, 32

    key = jax.random.PRNGKey(0)
    kx, kw, kb = jax.random.split(key, 3)

    x = jax.random.normal(kx, (B, S, IN_DIM), dtype=jnp.float32)
    # Linear-layer-style init scale keeps outputs O(1).
    weight = jax.random.normal(kw, (D_MODEL, IN_DIM), dtype=jnp.float32) / math.sqrt(IN_DIM)
    bias = jax.random.normal(kb, (D_MODEL,), dtype=jnp.float32) * 0.1

    out = input_embedding_forward(x, weight, bias)
    out = jax.block_until_ready(out)

    # Plain-JAX reference (same semantics as the PyTorch forward).
    ref = jnp.einsum("bsk,nk->bsn", x, weight) + bias

    assert out.shape == (B, S, D_MODEL)
    assert jnp.allclose(out, ref, atol=2e-2, rtol=2e-2), "mismatch vs reference"

    print("KERNEL_OK")
</pallas_src>

<mosaic_0001>
module attributes {stable_mosaic.version = 11 : i64} {
  func.func @_linear_kernel(%arg0: i32, %arg1: i32, %arg2: i32, %arg3: memref<16x16xf32, #tpu.memory_space<vmem>>, %arg4: memref<16x32xf32, #tpu.memory_space<vmem>>, %arg5: memref<1x32xf32, #tpu.memory_space<vmem>>, %arg6: memref<16x32xf32, #tpu.memory_space<vmem>>, %arg7: memref<16x32xf32, #tpu.memory_space<vmem>>) attributes {dimension_semantics = [#tpu.dimension_semantics<parallel>, #tpu.dimension_semantics<parallel>, #tpu.dimension_semantics<arbitrary>], iteration_bounds = array<i64: 1, 1, 1>, scalar_prefetch = 0 : i64, scratch_operands = 1 : i64, tpu.core_type = #tpu.core_type<tc>, window_params = [{transform_indices = @transform_0, window_bounds = array<i64: 16, 16>}, {transform_indices = @transform_1, window_bounds = array<i64: 16, 32>}, {transform_indices = @transform_2, window_bounds = array<i64: 1, 32>}, {transform_indices = @transform_3, window_bounds = array<i64: 16, 32>}]} {
    %c0_i32 = arith.constant 0 : i32
    %0 = arith.cmpi eq, %arg2, %c0_i32 : i32
    %1 = arith.extui %0 : i1 to i32
    %c0_i32_0 = arith.constant 0 : i32
    %2 = arith.cmpi ne, %1, %c0_i32_0 : i32
    scf.if %2 {
      %cst_10 = arith.constant 0.000000e+00 : f32
      %12 = vector.broadcast %cst_10 : f32 to vector<16x32xf32>
      %c0_11 = arith.constant 0 : index
      %c0_12 = arith.constant 0 : index
      %13 = vector.load %arg7[%c0_11, %c0_12] : memref<16x32xf32, #tpu.memory_space<vmem>>, vector<16x32xf32>
      tpu.vector_store %arg7[%c0_11, %c0_12], %12 {strides = array<i32>} : memref<16x32xf32, #tpu.memory_space<vmem>>, vector<16x32xf32>,
    } else {
    }
    %c0 = arith.constant 0 : index
    %c0_1 = arith.constant 0 : index
    %3 = vector.load %arg7[%c0, %c0_1] : memref<16x32xf32, #tpu.memory_space<vmem>>, vector<16x32xf32>
    %c0_2 = arith.constant 0 : index
    %c0_3 = arith.constant 0 : index
    %4 = vector.load %arg3[%c0_2, %c0_3] : memref<16x16xf32, #tpu.memory_space<vmem>>, vector<16x16xf32>
    %c0_4 = arith.constant 0 : index
    %c0_5 = arith.constant 0 : index
    %5 = vector.load %arg4[%c0_4, %c0_5] : memref<16x32xf32, #tpu.memory_space<vmem>>, vector<16x32xf32>
    %cst = arith.constant dense<0.000000e+00> : vector<16x32xf32>
    %6 = tpu.matmul %4, %5, %cst {dimension_numbers = #tpu.dot_dimension_numbers<[1], [0], [0], [1], [0, 0, 1, 1], [], []>} : vector<16x16xf32>, vector<16x32xf32>, vector<16x32xf32> -> vector<16x32xf32>
    %7 = arith.addf %3, %6 : vector<16x32xf32>
    %c0_6 = arith.constant 0 : index
    %c0_7 = arith.constant 0 : index
    %8 = vector.load %arg7[%c0_6, %c0_7] : memref<16x32xf32, #tpu.memory_space<vmem>>, vector<16x32xf32>
    tpu.vector_store %arg7[%c0_6, %c0_7], %7 {strides = array<i32>} : memref<16x32xf32, #tpu.memory_space<vmem>>, vector<16x32xf32>,
    %c0_i32_8 = arith.constant 0 : i32
    %9 = arith.cmpi eq, %arg2, %c0_i32_8 : i32
    %10 = arith.extui %9 : i1 to i32
    %c0_i32_9 = arith.constant 0 : i32
    %11 = arith.cmpi ne, %10, %c0_i32_9 : i32
    scf.if %11 {
      %c0_10 = arith.constant 0 : index
      %c0_11 = arith.constant 0 : index
      %12 = vector.load %arg7[%c0_10, %c0_11] : memref<16x32xf32, #tpu.memory_space<vmem>>, vector<16x32xf32>
      %c0_12 = arith.constant 0 : index
      %c0_13 = arith.constant 0 : index
      %13 = vector.load %arg5[%c0_12, %c0_13] : memref<1x32xf32, #tpu.memory_space<vmem>>, vector<1x32xf32>
      %14 = vector.broadcast %13 : vector<1x32xf32> to vector<16x32xf32>
      %15 = arith.addf %12, %14 : vector<16x32xf32>
      %c0_14 = arith.constant 0 : index
      %c0_15 = arith.constant 0 : index
      %16 = vector.load %arg6[%c0_14, %c0_15] : memref<16x32xf32, #tpu.memory_space<vmem>>, vector<16x32xf32>
      tpu.vector_store %arg6[%c0_14, %c0_15], %15 {strides = array<i32>} : memref<16x32xf32, #tpu.memory_space<vmem>>, vector<16x32xf32>,
    } else {
    }
    return
  }
  func.func @transform_0(%arg0: i32, %arg1: i32, %arg2: i32) -> (i32, i32) {
    %c0_i32 = arith.constant 0 : i32
    return %arg0, %arg2 : i32, i32
  }
  func.func @transform_1(%arg0: i32, %arg1: i32, %arg2: i32) -> (i32, i32) {
    %c0_i32 = arith.constant 0 : i32
    return %arg2, %arg1 : i32, i32
  }
  func.func @transform_2(%arg0: i32, %arg1: i32, %arg2: i32) -> (i32, i32) {
    %c0_i32 = arith.constant 0 : i32
    %c0_i32_0 = arith.constant 0 : i32
    return %c0_i32, %arg1 : i32, i32
  }
  func.func @transform_3(%arg0: i32, %arg1: i32, %arg2: i32) -> (i32, i32) {
    %c0_i32 = arith.constant 0 : i32
    return %arg0, %arg1 : i32, i32
  }
}

</mosaic_0001>

<bundles_post_ra>
// kernel: tpu_custom_call.1
= control target key start
LH: loop header
LB: loop body
LE: loop exit
PB: predicated region body
PF: predicated region fallthrough
CT: control target
= control target key end

     0   :  { %8 = vsyncpa [#allocation4], 0  ;;  %s316_s0 = inlined_call_operand.hbm [shape: f32[16,16], index: 0, kind: input, shape index: {}]   ;;  %s317_s1 = inlined_call_operand.hbm [shape: f32[16,32], index: 1, kind: input, shape index: {}]   ;;  %s318_s2 = inlined_call_operand.vmem [shape: f32[1,32], index: 2, kind: input, shape index: {}]   ;;  %s319_s3 = inlined_call_operand.hbm [shape: f32[16,32], index: 3, kind: output, shape index: {}]  }
   0x1   :  { %9 = vsyncpa [#allocation7], 0 }
   0x2   :  { %10 = vsyncpa [#allocation5], 0  ;;  %s263_s12 = smov [#allocation3]  }
   0x3   :  { %s16_s13 = sshll.u32 %s263_s12, 4  ;;  %s17_s13 = int_to_ptr.vmem [resolvable:$true] %s16_s13 }
   0x4   :  { %s205_s14 = scalar_lea.vmem %s17_s13, 256  ;;  %p210_p1 = scmp.lt.s32.totalorder %s17_s13, %s17_s13 }
   0x5   :  { %p206_p0 = scmp.ne.s32.totalorder %s17_s13, %s205_s14  ;;  %p211_p2 = scmp.lt.s32.totalorder %s205_s14, %s205_s14 }
   0x7   :  { %p212_p3 = por %p211_p2, %p210_p1 }
   0x9   :  { %p213_p4 = pnand %p212_p3, %p206_p0 }
   0xb   :  { %216 = shalt.err (!%p213_p4)
}
   0xc   :  { %s264_s15 = smov 128   ;;  %s265_s16 = smov 8  }
   0xd   :  { %22 = dma.hbm_to_vmem [thread:$0]  %s316_s0, 256, %s17_s13, [#allocation4], %s264_s15, %s264_s15, %s265_s16  }
   0xe   :  { %s266_s19 = smov [#allocation6]  }
   0xf   :  { %s28_s20 = sshll.u32 %s266_s19, 4  ;;  %s29_s20 = int_to_ptr.vmem [resolvable:$true] %s28_s20 }
  0x10   :  { %s225_s21 = scalar_lea.vmem %s29_s20, 256  ;;  %p230_p6 = scmp.lt.s32.totalorder %s29_s20, %s29_s20 }
  0x11   :  { %p226_p5 = scmp.ne.s32.totalorder %s29_s20, %s225_s21  ;;  %p231_p7 = scmp.lt.s32.totalorder %s225_s21, %s225_s21 }
  0x13   :  { %p232_p8 = por %p231_p7, %p230_p6 }
  0x15   :  { %p233_p9 = pnand %p232_p8, %p226_p5 }
  0x17   :  { %236 = shalt.err (!%p233_p9)
}
  0x18   :  { %34 = dma.hbm_to_vmem [thread:$0]  %s317_s1, 256, %s29_s20, [#allocation7], %s264_s15, %s264_s15, %s265_s16  }
  0x19   :  { %257 = dma.done.wait [#allocation4], 256  }
  0x1a   :  { %258 = vsyncadd [#allocation4], 4294967040 }
  0x1b   :  { %259 = dma.done.wait [#allocation7], 256  }
  0x1c   :  { %260 = vsyncadd [#allocation7], 4294967040  ;;  %vm47_vm0 = vcmask 261120   ;;  %v267_v0 = vmov 0.0   ;;  %vm56_vm1 = vcmask 130048   ;;  %v55_v1 = vld [vmem:[#allocation6 + $0x8] sm:$0xff] }
  0x1d   :  { %49 = vst.msk [vmem:[#allocation2 + $0x8] sm:$0xff] %vm47_vm0, %v267_v0  ;;  %48 = vst.msk [vmem:[#allocation2] sm:$0xff] %vm47_vm0, %v267_v0  ;;  %v54_v2 = vld [vmem:[#allocation6] sm:$0xff]  ;;  %v52_v3 = vld [vmem:[#allocation3] sm:$0xff]  ;;  %184 = vmatprep.subr.mxu0 %v55_v1  ;;  %s268_s24 = smov [#allocation8]  }
  0x1e   :  { %188 = vmatprep.mubr.msk.f32.mxu0 %vm56_vm1, %v52_v3  ;;  %185 = vmatpush3.msra.mxu0 %v55_v1  ;;  %v53_v4 = vld [vmem:[#allocation3 + $0x8] sm:$0xff]  ;;  %v179_v11 = vld [vmem:[%s318_s2] ss:$0 sm:$0xff]  ;;  %s164_s25 = sshll.u32 %s268_s24, 4  ;;  %s165_s25 = int_to_ptr.vmem [resolvable:$true] %s164_s25 }
  0x1f   :  { %186 = vmatprep.subr.mxu0 %v54_v2  ;;  %s237_s26 = scalar_lea.vmem %s165_s25, 256  ;;  %p242_p11 = scmp.lt.s32.totalorder %s165_s25, %s165_s25 }
  0x20   :  { %187 = vmatpush3.msra.mxu0 %v54_v2  ;;  %p238_p10 = scmp.ne.s32.totalorder %s165_s25, %s237_s26  ;;  %p243_p12 = scmp.lt.s32.totalorder %s237_s26, %s237_s26 }
  0x21   :  { %189 = vmatmul.mubr.msk.f32.vlgmr.msra.gmra.mxu0 %vm56_vm1, %v53_v4 }
  0x22   :  { %p244_p13 = por %p243_p12, %p242_p11 }
  0x24   :  { %v51_v5 = vld [vmem:[#allocation2 + $0x8] sm:$0xff]  ;;  %v50_v7 = vld [vmem:[#allocation2] sm:$0xff]  ;;  %p245_p0 = pnand %p244_p13, %p238_p10 }
  0xe1   :  { %v190_v6 = vpop.f32.mrf.mxu0 }
  0xe2   :  { %v139_v8 = vadd.f32 %v190_v6, %v51_v5 }
  0xe3   :  { %v129_v9 = vpop.f32.mrf.mxu0 }
  0xe4   :  { %142 = vst.msk [vmem:[#allocation2 + $0x8] sm:$0xff] %vm47_vm0, %v139_v8  ;;  %v138_v10 = vadd.f32 %v129_v9, %v50_v7 }
  0xe6   :  { %141 = vst.msk [vmem:[#allocation2] sm:$0xff] %vm47_vm0, %v138_v10 }
  0xeb   :  { %v147_v12 = vld [vmem:[#allocation2 + $0x8] sm:$0xff] }
  0xec   :  { %v156_v13 = vadd.f32 %v179_v11, %v147_v12 }
  0xed   :  { %v146_v14 = vld [vmem:[#allocation2] sm:$0xff] }
  0xee   :  { %v155_v15 = vadd.f32 %v179_v11, %v146_v14  ;;  %158 = vst.msk [vmem:[#allocation8 + $0x8] sm:$0xff] %vm47_vm0, %v156_v13 }
  0xf0   :  { %157 = vst.msk [vmem:[#allocation8] sm:$0xff] %vm47_vm0, %v155_v15 }
  0xf1   :  { %248 = shalt.err (!%p245_p0)
}
  0xf2   :  { %170 = dma.vmem_to_hbm [thread:$0]  %s165_s25, 256, %s319_s3, [#allocation5], %s264_s15, %s264_s15, %s265_s16  }
  0xf3   :  { %261 = dma.done.wait [#allocation5], 256  }
  0xf4   :  { %262 = vsyncadd [#allocation5], 4294967040 }
  0xf5   :  { %174 = vsyncpa [#allocation4], 1 }
  0xf6   :  { %175 = vsyncpa [#allocation7], 1 }
  0xf7   :  { %176 = vsyncpa [#allocation5], 1 }

</bundles_post_ra>
